<compile_context>
chip_gen: v7x
topology: tpu7x:2x2x1
jax: 0.10.0
libtpu: 0.0.40
codegen_flags: <defaults>
</compile_context>

<pallas_src>
import functools
import math

import numpy as np
import jax
import jax.numpy as jnp
from jax import lax
from jax.experimental import pallas as pl
from jax.experimental.pallas import tpu as pltpu


def linear_encoder_kernel(x_ref, w1r_ref, w2r_ref, cola_ref, colb_ref, o_ref,
                          rowa_ref, rowb_ref, *, tm, tn, n_out):
    """One (tm, tn) tile of the pair grid, stored lane-dense as (tm, tn*n_out).

    rowa_ref/rowb_ref are VMEM scratch holding the lane-dense row terms
      rowa[r, s*n_out + c] = A[i0+r, c],   rowb[r, s*n_out + c] = B[i0+r, c]
    for the current i-block; (re)computed only on the first j tile.
    """
    i0 = pl.program_id(0) * tm          # first global row index (i) of this tile
    j0 = pl.program_id(1) * tn          # first global column index (j) of this tile
    L = tn * n_out

    # Hoisted out of the j loop: one tiny-K matmul per i-block, producing the
    # row terms directly in the lane-dense layout (weights are lane-replicated
    # tn times in the wrapper, so the matmul doubles as the "repeat over j").
    @pl.when(pl.program_id(1) == 0)
    def _():
        x_i = x_ref[...]                                             # (tm, n_in_p)
        rowa_ref[...] = jnp.dot(x_i, w1r_ref[...],
                                preferred_element_type=jnp.float32)  # (tm, L)
        rowb_ref[...] = jnp.dot(x_i, w2r_ref[...],
                                preferred_element_type=jnp.float32)  # (tm, L)

    col_a = cola_ref[...]               # (1, L): A[j0+s, c] + b[c]
    col_b = colb_ref[...]               # (1, L): B[j0+s, c] + b[c]

    strictly_above = i0 + tm <= j0      # every element of this tile has i < j
    strictly_below = j0 + tn <= i0      # every element of this tile has i > j

    @pl.when(strictly_above)
    def _():                            # out[i, j] = A[i] + B[j] + b
        o_ref[...] = (rowa_ref[...] + col_b).astype(o_ref.dtype)

    @pl.when(strictly_below)
    def _():                            # out[i, j] = B[i] + A[j] + b
        o_ref[...] = (rowb_ref[...] + col_a).astype(o_ref.dtype)

    @pl.when(jnp.logical_not(jnp.logical_or(strictly_above, strictly_below)))
    def _():
        # Diagonal-straddling tile: per-element masks from broadcastable
        # (tm, 1) / (1, L) iotas (no integer division, no full-size int temps).
        #   global i = i0 + r, global j = j0 + lane // n_out
        #   i <  j  <=>  lane >= n_out * (i - j0 + 1)
        #   i == j  <=>  n_out * (i - j0) <= lane < n_out * (i - j0 + 1)
        row_rel = lax.broadcasted_iota(jnp.int32, (tm, 1), 0) + (i0 - j0)
        lane = lax.broadcasted_iota(jnp.int32, (1, L), 1)
        lo = row_rel * n_out
        hi = lo + n_out
        lt = lane >= hi                                    # (tm, L): i < j
        diag = jnp.logical_and(lane >= lo, lane < hi)      # (tm, L): i == j
        val = (jnp.where(lt, rowa_ref[...], rowb_ref[...])
               + jnp.where(lt, col_b, col_a))
        val = jnp.where(diag, 0.0, val)
        o_ref[...] = val.astype(o_ref.dtype)


def _choose_tiles(N, n_out, elem_bytes=4, block_budget_bytes=4 << 20,
                  max_lane_width=1024):
    """Pick (tm, tn): tn*n_out is a multiple of 128 (unmasked lane-dense
    stores), capped near `max_lane_width` lanes; tm is a multiple of 8 grown
    until the output tile reaches the VMEM budget.  Both are powers of two so
    lcm(tm, tn) == max(tm, tn) and wrapper-side padding of N stays small."""
    tn = 128 // math.gcd(n_out, 128)                 # minimal lane-dense tn
    while tn * n_out * 2 <= max_lane_width and tn < N:
        tn *= 2
    L = tn * n_out
    tm = 8
    while tm * 2 * L * elem_bytes <= block_budget_bytes and tm < N:
        tm *= 2
    return tm, tn


def linear_encoder_forward(x, W, b, *, tm=None, tn=None):
    """x: (N, n_in), W: (n_out, 2*n_in), b: (n_out,) -> (N, N, n_out)."""
    N, n_in = x.shape
    n_out = W.shape[0]

    tm_a, tn_a = _choose_tiles(N, n_out)
    tm = tm_a if tm is None else tm
    tn = tn_a if tn is None else tn
    assert (tn * n_out) % 128 == 0 and tm % 8 == 0, "tiles must be lane/sublane aligned"
    L = tn * n_out

    # Wrapper-side padding: N up to a common multiple of (tm, tn) so a
    # lane-dense tile grid always exists; n_in up to 8 sublanes.
    step = tm * tn // math.gcd(tm, tn)
    n_pad = ((N + step - 1) // step) * step
    n_in_p = ((n_in + 7) // 8) * 8
    x_p = jnp.pad(x, ((0, n_pad - N), (0, n_in_p - n_in)))

    w1t = jnp.asarray(W[:, :n_in].T)                 # (n_in, n_out)
    w2t = jnp.asarray(W[:, n_in:].T)
    w1t_p = jnp.pad(w1t, ((0, n_in_p - n_in), (0, 0)))
    w2t_p = jnp.pad(w2t, ((0, n_in_p - n_in), (0, 0)))
    b = jnp.asarray(b)

    # Column-oriented terms (bias folded in), flattened lane-dense.
    A = x_p @ w1t_p                                  # (n_pad, n_out)
    B = x_p @ w2t_p
    col_a = (A + b[None, :]).reshape(1, n_pad * n_out)   # used where i > j
    col_b = (B + b[None, :]).reshape(1, n_pad * n_out)   # used where i < j

    # Row-oriented weights replicated tn times along the lane axis (tiny).
    w1_rep = jnp.tile(w1t_p, (1, tn))                # (n_in_p, L)
    w2_rep = jnp.tile(w2t_p, (1, tn))

    grid = (n_pad // tm, n_pad // tn)
    kernel = functools.partial(linear_encoder_kernel, tm=tm, tn=tn, n_out=n_out)

    # Scoped-VMEM request: double-buffered output + row scratch + the (small)
    # double-buffered inputs, with 2x headroom, clamped to fit v7x's 64 MiB/TC.
    out_tile = tm * L * 4
    vmem_need = (2 * out_tile                 # double-buffered output block
                 + 2 * out_tile               # rowa/rowb scratch
                 + 2 * 2 * n_in_p * L * 4     # w1_rep/w2_rep (double-buffered)
                 + 2 * tm * n_in_p * 4        # x block
                 + 2 * 2 * L * 4)             # col_a/col_b blocks
    vmem_limit = int(min(48 << 20, max(16 << 20, 2 * vmem_need)))

    out2d = pl.pallas_call(
        kernel,
        out_shape=jax.ShapeDtypeStruct((n_pad, n_pad * n_out), x.dtype),
        grid=grid,
        in_specs=[
            pl.BlockSpec((tm, n_in_p), lambda i, j: (i, 0)),   # x rows (per i-block)
            pl.BlockSpec((n_in_p, L), lambda i, j: (0, 0)),    # W1 lane-replicated
            pl.BlockSpec((n_in_p, L), lambda i, j: (0, 0)),    # W2 lane-replicated
            pl.BlockSpec((1, L), lambda i, j: (0, j)),         # A[j]+b (per j-block)
            pl.BlockSpec((1, L), lambda i, j: (0, j)),         # B[j]+b (per j-block)
        ],
        out_specs=pl.BlockSpec((tm, L), lambda i, j: (i, j)),
        scratch_shapes=[pltpu.VMEM((tm, L), jnp.float32),      # rowa (per i-block)
                        pltpu.VMEM((tm, L), jnp.float32)],     # rowb (per i-block)
        compiler_params=pltpu.CompilerParams(
            # j must be "arbitrary": rowa/rowb scratch is filled at j == 0 and
            # reused across the whole j sweep of each i-block.
            dimension_semantics=("parallel", "arbitrary"),
            vmem_limit_bytes=vmem_limit),
    )(x_p, w1_rep, w2_rep, col_a, col_b)

    out = out2d.reshape(n_pad, n_pad, n_out)
    return out[:N, :N] if n_pad != N else out


def linear_encoder_reference(x, W, b):
    """Pure-JAX mirror of the PyTorch forward (sym=True)."""
    N, n_in = x.shape
    A = x @ W[:, :n_in].T
    B = x @ W[:, n_in:].T
    i_idx, j_idx = jnp.triu_indices(N, k=1)
    vals = A[i_idx] + B[j_idx] + b[None, :]
    out = jnp.zeros((N, N, W.shape[0]), x.dtype).at[i_idx, j_idx].set(vals)
    return out + out.transpose(1, 0, 2)


if __name__ == "__main__":
    root = jax.random.PRNGKey(0)

    def run_case(key, N, n_in, n_out, tm=None, tn=None):
        kx, kw = jax.random.split(key)
        x = jax.random.normal(kx, (N, n_in), dtype=jnp.float32)
        # xavier_normal_ on fc.weight (n_out, 2*n_in); bias filled with 0.1.
        std = float(np.sqrt(2.0 / (2 * n_in + n_out)))
        W = std * jax.random.normal(kw, (n_out, 2 * n_in), dtype=jnp.float32)
        b = jnp.full((n_out,), 0.1, dtype=jnp.float32)

        out = jax.block_until_ready(linear_encoder_forward(x, W, b, tm=tm, tn=tn))
        ref = linear_encoder_reference(x, W, b)
        assert out.shape == (N, N, n_out)
        np.testing.assert_allclose(np.asarray(out), np.asarray(ref),
                                   rtol=1e-5, atol=1e-5)

    k1, k2, k3 = jax.random.split(root, 3)
    run_case(k1, N=8, n_in=4, n_out=32)                  # module's small example
    run_case(k2, N=32, n_in=4, n_out=16, tm=8, tn=8)     # 4x4 grid: strict + straddle tiles
    run_case(k3, N=20, n_in=5, n_out=24, tm=8, tn=16)    # non-divisible N -> padding path

    print("KERNEL_OK")
</pallas_src>

<mosaic_0001>
module attributes {stable_mosaic.version = 11 : i64} {
  func.func @linear_encoder_kernel(%arg0: i32, %arg1: i32, %arg2: memref<8x8xf32, #tpu.memory_space<vmem>>, %arg3: memref<8x256xf32, #tpu.memory_space<vmem>>, %arg4: memref<8x256xf32, #tpu.memory_space<vmem>>, %arg5: memref<1x256xf32, #tpu.memory_space<vmem>>, %arg6: memref<1x256xf32, #tpu.memory_space<vmem>>, %arg7: memref<8x256xf32, #tpu.memory_space<vmem>>, %arg8: memref<8x256xf32, #tpu.memory_space<vmem>>, %arg9: memref<8x256xf32, #tpu.memory_space<vmem>>) attributes {dimension_semantics = [#tpu.dimension_semantics<parallel>, #tpu.dimension_semantics<arbitrary>], iteration_bounds = array<i64: 1, 1>, scalar_prefetch = 0 : i64, scratch_operands = 2 : i64, tpu.core_type = #tpu.core_type<tc>, window_params = [{transform_indices = @transform_0, window_bounds = array<i64: 8, 8>}, {pipeline_mode = #tpu.pipeline_mode<synchronous>, transform_indices = @transform_1, window_bounds = array<i64: 8, 256>}, {pipeline_mode = #tpu.pipeline_mode<synchronous>, transform_indices = @transform_2, window_bounds = array<i64: 8, 256>}, {transform_indices = @transform_3, window_bounds = array<i64: 1, 256>}, {transform_indices = @transform_4, window_bounds = array<i64: 1, 256>}, {transform_indices = @transform_5, window_bounds = array<i64: 8, 256>}]} {
    %c8_i32 = arith.constant 8 : i32
    %0 = arith.muli %arg0, %c8_i32 : i32
    %c8_i32_0 = arith.constant 8 : i32
    %1 = arith.muli %arg1, %c8_i32_0 : i32
    %c0_i32 = arith.constant 0 : i32
    %2 = arith.cmpi eq, %arg1, %c0_i32 : i32
    %3 = arith.extui %2 : i1 to i32
    %c0_i32_1 = arith.constant 0 : i32
    %4 = arith.cmpi ne, %3, %c0_i32_1 : i32
    scf.if %4 {
      %c0_10 = arith.constant 0 : index
      %c0_11 = arith.constant 0 : index
      %19 = vector.load %arg2[%c0_10, %c0_11] : memref<8x8xf32, #tpu.memory_space<vmem>>, vector<8x8xf32>
      %c0_12 = arith.constant 0 : index
      %c0_13 = arith.constant 0 : index
      %20 = vector.load %arg3[%c0_12, %c0_13] : memref<8x256xf32, #tpu.memory_space<vmem>>, vector<8x256xf32>
      %cst = arith.constant dense<0.000000e+00> : vector<8x256xf32>
      %21 = tpu.matmul %19, %20, %cst {dimension_numbers = #tpu.dot_dimension_numbers<[1], [0], [0], [1], [0, 0, 1, 1], [], []>} : vector<8x8xf32>, vector<8x256xf32>, vector<8x256xf32> -> vector<8x256xf32>
      %c0_14 = arith.constant 0 : index
      %c0_15 = arith.constant 0 : index
      %22 = vector.load %arg8[%c0_14, %c0_15] : memref<8x256xf32, #tpu.memory_space<vmem>>, vector<8x256xf32>
      tpu.vector_store %arg8[%c0_14, %c0_15], %21 {strides = array<i32>} : memref<8x256xf32, #tpu.memory_space<vmem>>, vector<8x256xf32>,
      %c0_16 = arith.constant 0 : index
      %c0_17 = arith.constant 0 : index
      %23 = vector.load %arg4[%c0_16, %c0_17] : memref<8x256xf32, #tpu.memory_space<vmem>>, vector<8x256xf32>
      %cst_18 = arith.constant dense<0.000000e+00> : vector<8x256xf32>
      %24 = tpu.matmul %19, %23, %cst_18 {dimension_numbers = #tpu.dot_dimension_numbers<[1], [0], [0], [1], [0, 0, 1, 1], [], []>} : vector<8x8xf32>, vector<8x256xf32>, vector<8x256xf32> -> vector<8x256xf32>
      %c0_19 = arith.constant 0 : index
      %c0_20 = arith.constant 0 : index
      %25 = vector.load %arg9[%c0_19, %c0_20] : memref<8x256xf32, #tpu.memory_space<vmem>>, vector<8x256xf32>
      tpu.vector_store %arg9[%c0_19, %c0_20], %24 {strides = array<i32>} : memref<8x256xf32, #tpu.memory_space<vmem>>, vector<8x256xf32>,
    } else {
    }
    %c0 = arith.constant 0 : index
    %c0_2 = arith.constant 0 : index
    %5 = vector.load %arg5[%c0, %c0_2] : memref<1x256xf32, #tpu.memory_space<vmem>>, vector<1x256xf32>
    %c0_3 = arith.constant 0 : index
    %c0_4 = arith.constant 0 : index
    %6 = vector.load %arg6[%c0_3, %c0_4] : memref<1x256xf32, #tpu.memory_space<vmem>>, vector<1x256xf32>
    %c8_i32_5 = arith.constant 8 : i32
    %7 = arith.addi %0, %c8_i32_5 : i32
    %8 = arith.cmpi sle, %7, %1 : i32
    %c8_i32_6 = arith.constant 8 : i32
    %9 = arith.addi %1, %c8_i32_6 : i32
    %10 = arith.cmpi sle, %9, %0 : i32
    %11 = arith.extui %8 : i1 to i32
    %c0_i32_7 = arith.constant 0 : i32
    %12 = arith.cmpi ne, %11, %c0_i32_7 : i32
    scf.if %12 {
      %c0_10 = arith.constant 0 : index
      %c0_11 = arith.constant 0 : index
      %19 = vector.load %arg8[%c0_10, %c0_11] : memref<8x256xf32, #tpu.memory_space<vmem>>, vector<8x256xf32>
      %20 = vector.broadcast %6 : vector<1x256xf32> to vector<8x256xf32>
      %21 = arith.addf %19, %20 : vector<8x256xf32>
      %c0_12 = arith.constant 0 : index
      %c0_13 = arith.constant 0 : index
      %22 = vector.load %arg7[%c0_12, %c0_13] : memref<8x256xf32, #tpu.memory_space<vmem>>, vector<8x256xf32>
      tpu.vector_store %arg7[%c0_12, %c0_13], %21 {strides = array<i32>} : memref<8x256xf32, #tpu.memory_space<vmem>>, vector<8x256xf32>,
    } else {
    }
    %13 = arith.extui %10 : i1 to i32
    %c0_i32_8 = arith.constant 0 : i32
    %14 = arith.cmpi ne, %13, %c0_i32_8 : i32
    scf.if %14 {
      %c0_10 = arith.constant 0 : index
      %c0_11 = arith.constant 0 : index
      %19 = vector.load %arg9[%c0_10, %c0_11] : memref<8x256xf32, #tpu.memory_space<vmem>>, vector<8x256xf32>
      %20 = vector.broadcast %5 : vector<1x256xf32> to vector<8x256xf32>
      %21 = arith.addf %19, %20 : vector<8x256xf32>
      %c0_12 = arith.constant 0 : index
      %c0_13 = arith.constant 0 : index
      %22 = vector.load %arg7[%c0_12, %c0_13] : memref<8x256xf32, #tpu.memory_space<vmem>>, vector<8x256xf32>
      tpu.vector_store %arg7[%c0_12, %c0_13], %21 {strides = array<i32>} : memref<8x256xf32, #tpu.memory_space<vmem>>, vector<8x256xf32>,
    } else {
    }
    %15 = arith.ori %8, %10 : i1
    %true = arith.constant true
    %16 = arith.xori %15, %true : i1
    %17 = arith.extui %16 : i1 to i32
    %c0_i32_9 = arith.constant 0 : i32
    %18 = arith.cmpi ne, %17, %c0_i32_9 : i32
    scf.if %18 {
      %19 = tpu.iota {dimensions = array<i32: 0>} : vector<8x1xi32>
      %20 = arith.subi %0, %1 : i32
      %21 = vector.broadcast %20 : i32 to vector<8x1xi32>
      %22 = arith.addi %19, %21 : vector<8x1xi32>
      %23 = tpu.iota {dimensions = array<i32: 1>} : vector<1x256xi32>
      %c32_i32 = arith.constant 32 : i32
      %24 = vector.broadcast %c32_i32 : i32 to vector<8x1xi32>
      %25 = arith.muli %22, %24 : vector<8x1xi32>
      %c32_i32_10 = arith.constant 32 : i32
      %26 = vector.broadcast %c32_i32_10 : i32 to vector<8x1xi32>
      %27 = arith.addi %25, %26 : vector<8x1xi32>
      %28 = vector.broadcast %23 : vector<1x256xi32> to vector<8x256xi32>
      %29 = vector.broadcast %27 : vector<8x1xi32> to vector<8x256xi32>
      %30 = arith.cmpi sge, %28, %29 : vector<8x256xi32>
      %31 = vector.broadcast %23 : vector<1x256xi32> to vector<8x256xi32>
      %32 = vector.broadcast %25 : vector<8x1xi32> to vector<8x256xi32>
      %33 = arith.cmpi sge, %31, %32 : vector<8x256xi32>
      %34 = vector.broadcast %23 : vector<1x256xi32> to vector<8x256xi32>
      %35 = vector.broadcast %27 : vector<8x1xi32> to vector<8x256xi32>
      %36 = arith.cmpi slt, %34, %35 : vector<8x256xi32>
      %37 = arith.andi %33, %36 : vector<8x256xi1>
      %c0_11 = arith.constant 0 : index
      %c0_12 = arith.constant 0 : index
      %38 = vector.load %arg8[%c0_11, %c0_12] : memref<8x256xf32, #tpu.memory_space<vmem>>, vector<8x256xf32>
      %c0_13 = arith.constant 0 : index
      %c0_14 = arith.constant 0 : index
      %39 = vector.load %arg9[%c0_13, %c0_14] : memref<8x256xf32, #tpu.memory_space<vmem>>, vector<8x256xf32>
      %40 = arith.select %30, %38, %39 : vector<8x256xi1>, vector<8x256xf32>
      %41 = vector.shape_cast %6 : vector<1x256xf32> to vector<1x256xf32>
      %42 = vector.broadcast %41 : vector<1x256xf32> to vector<8x256xf32>
      %43 = vector.shape_cast %5 : vector<1x256xf32> to vector<1x256xf32>
      %44 = vector.broadcast %43 : vector<1x256xf32> to vector<8x256xf32>
      %45 = arith.select %30, %42, %44 : vector<8x256xi1>, vector<8x256xf32>
      %46 = arith.addf %40, %45 : vector<8x256xf32>
      %cst = arith.constant 0.000000e+00 : f32
      %47 = vector.broadcast %cst : f32 to vector<8x256xf32>
      %48 = arith.select %37, %47, %46 : vector<8x256xi1>, vector<8x256xf32>
      %c0_15 = arith.constant 0 : index
      %c0_16 = arith.constant 0 : index
      %49 = vector.load %arg7[%c0_15, %c0_16] : memref<8x256xf32, #tpu.memory_space<vmem>>, vector<8x256xf32>
      tpu.vector_store %arg7[%c0_15, %c0_16], %48 {strides = array<i32>} : memref<8x256xf32, #tpu.memory_space<vmem>>, vector<8x256xf32>,
    } else {
    }
    return
  }
  func.func @transform_0(%arg0: i32, %arg1: i32) -> (i32, i32) {
    %c0_i32 = arith.constant 0 : i32
    %c0_i32_0 = arith.constant 0 : i32
    return %arg0, %c0_i32 : i32, i32
  }
  func.func @transform_1(%arg0: i32, %arg1: i32) -> (i32, i32) {
    %c0_i32 = arith.constant 0 : i32
    %c0_i32_0 = arith.constant 0 : i32
    %c0_i32_1 = arith.constant 0 : i32
    return %c0_i32, %c0_i32_0 : i32, i32
  }
  func.func @transform_2(%arg0: i32, %arg1: i32) -> (i32, i32) {
    %c0_i32 = arith.constant 0 : i32
    %c0_i32_0 = arith.constant 0 : i32
    %c0_i32_1 = arith.constant 0 : i32
    return %c0_i32, %c0_i32_0 : i32, i32
  }
  func.func @transform_3(%arg0: i32, %arg1: i32) -> (i32, i32) {
    %c0_i32 = arith.constant 0 : i32
    %c0_i32_0 = arith.constant 0 : i32
    return %c0_i32, %arg1 : i32, i32
  }
  func.func @transform_4(%arg0: i32, %arg1: i32) -> (i32, i32) {
    %c0_i32 = arith.constant 0 : i32
    %c0_i32_0 = arith.constant 0 : i32
    return %c0_i32, %arg1 : i32, i32
  }
  func.func @transform_5(%arg0: i32, %arg1: i32) -> (i32, i32) {
    %c0_i32 = arith.constant 0 : i32
    return %arg0, %arg1 : i32, i32
  }
}

</mosaic_0001>

<bundles_post_ra>
// kernel: tpu_custom_call.1
= control target key start
LH: loop header
LB: loop body
LE: loop exit
PB: predicated region body
PF: predicated region fallthrough
CT: control target
= control target key end

     0   :  { %10 = vsyncpa [#allocation5], 0  ;;  %s529_s0 = inlined_call_operand.hbm [shape: f32[8,8], index: 0, kind: input, shape index: {}]   ;;  %s530_s1 = inlined_call_operand.hbm [shape: f32[8,256], index: 1, kind: input, shape index: {}]   ;;  %s531_s2 = inlined_call_operand.hbm [shape: f32[8,256], index: 2, kind: input, shape index: {}]   ;;  %s532_s3 = inlined_call_operand.vmem [shape: f32[1,256], index: 3, kind: input, shape index: {}]   ;;  %s533_s4 = inlined_call_operand.vmem [shape: f32[1,256], index: 4, kind: input, shape index: {}]   ;;  %s534_s5 = inlined_call_operand.hbm [shape: f32[8,256], index: 5, kind: output, shape index: {}]  }
   0x1   :  { %11 = vsyncpa [#allocation8], 0 }
   0x2   :  { %12 = vsyncpa [#allocation6], 0  ;;  %s438_s18 = smov [#allocation7]   ;;  %s439_s20 = smov [#allocation4]  }
   0x3   :  { %s29_s19 = sshll.u32 %s438_s18, 4  ;;  %s19_s21 = sshll.u32 %s439_s20, 4  ;;  %s30_s19 = int_to_ptr.vmem [resolvable:$true] %s29_s19  ;;  %s20_s21 = int_to_ptr.vmem [resolvable:$true] %s19_s21 }
   0x4   :  { %s344_s24 = scalar_lea.hbm %s530_s1, 256 }
   0x5   :  { %p345_p0 = scmp.ne.s32.totalorder %s530_s1, %s344_s24  ;;  %p348_p1 = scmp.lt.u32.totalorder %s344_s24, %s530_s1 }
   0x7   :  { %p350_p2 = pnand %p348_p1, %p345_p0 }
   0x9   :  { %353 = shalt.err (!%p350_p2)
}
   0xa   :  { %s354_s29 = scalar_lea.vmem %s30_s19, 256  ;;  %p359_p4 = scmp.lt.s32.totalorder %s30_s19, %s30_s19 }
   0xb   :  { %p355_p3 = scmp.ne.s32.totalorder %s30_s19, %s354_s29  ;;  %p360_p5 = scmp.lt.s32.totalorder %s354_s29, %s354_s29 }
   0xd   :  { %p361_p6 = por %p360_p5, %p359_p4 }
   0xf   :  { %p362_p7 = pnand %p361_p6, %p355_p3 }
  0x11   :  { %365 = shalt.err (!%p362_p7)
}
  0x12   :  { %32 = dma.hbm_to_vmem [thread:$0]  %s530_s1, 256, %s30_s19, [#allocation8]  }
  0x13   :  { %s366_s9 = scalar_lea.hbm %s529_s0, 128 }
  0x14   :  { %p367_p8 = scmp.ne.s32.totalorder %s529_s0, %s366_s9  ;;  %p370_p9 = scmp.lt.u32.totalorder %s366_s9, %s529_s0 }
  0x16   :  { %p372_p10 = pnand %p370_p9, %p367_p8 }
  0x18   :  { %375 = shalt.err (!%p372_p10)
}
  0x19   :  { %s376_s14 = scalar_lea.vmem %s20_s21, 128  ;;  %p381_p12 = scmp.lt.s32.totalorder %s20_s21, %s20_s21 }
  0x1a   :  { %p377_p11 = scmp.ne.s32.totalorder %s20_s21, %s376_s14  ;;  %p382_p13 = scmp.lt.s32.totalorder %s376_s14, %s376_s14 }
  0x1c   :  { %p383_p0 = por %p382_p13, %p381_p12 }
  0x1e   :  { %p384_p1 = pnand %p383_p0, %p377_p11 }
  0x20   :  { %387 = shalt.err (!%p384_p1)
}
  0x21   :  { %22 = dma.hbm_to_vmem [thread:$0]  %s529_s0, 128, %s20_s21, [#allocation5]  }
  0x22   :  { %s440_s16 = smov [#allocation9]   ;;  %s388_s20 = scalar_lea.hbm %s531_s2, 256 }
  0x23   :  { %s39_s17 = sshll.u32 %s440_s16, 4  ;;  %p389_p2 = scmp.ne.s32.totalorder %s531_s2, %s388_s20  ;;  %s40_s17 = int_to_ptr.vmem [resolvable:$true] %s39_s17 }
  0x24   :  { %p392_p3 = scmp.lt.u32.totalorder %s388_s20, %s531_s2 }
  0x26   :  { %p394_p4 = pnand %p392_p3, %p389_p2 }
  0x28   :  { %397 = shalt.err (!%p394_p4)
}
  0x29   :  { %s398_s26 = scalar_lea.vmem %s40_s17, 256  ;;  %p403_p6 = scmp.lt.s32.totalorder %s40_s17, %s40_s17 }
  0x2a   :  { %p399_p5 = scmp.ne.s32.totalorder %s40_s17, %s398_s26  ;;  %p404_p7 = scmp.lt.s32.totalorder %s398_s26, %s398_s26 }
  0x2c   :  { %p405_p8 = por %p404_p7, %p403_p6 }
  0x2e   :  { %p406_p9 = pnand %p405_p8, %p399_p5 }
  0x30   :  { %409 = shalt.err (!%p406_p9)
}
  0x31   :  { %42 = dma.hbm_to_vmem [thread:$0]  %s531_s2, 256, %s40_s17, [#allocation8]  }
  0x32   :  { %432 = dma.done.wait [#allocation5], 128  }
  0x33   :  { %433 = vsyncadd [#allocation5], 4294967168 }
  0x34   :  { %434 = dma.done.wait [#allocation8], 512  }
  0x35   :  { %435 = vsyncadd [#allocation8], 4294966784  ;;  %v441_v0 = vmov 0.0   ;;  %v64_v1 = vld [vmem:[#allocation7 + $0x8] sm:$0xff]  ;;  %v143_v2 = vld [vmem:[#allocation9 + $0x8] sm:$0xff]  ;;  %vm65_vm0 = vcmask 64512   ;;  %v267_v6 = vlaneseq }
  0x36   :  { %133 = vmatprep.mubr.f32.mxu0 %v441_v0  ;;  %208 = vmatprep.mubr.f32.mxu1 %v441_v0  ;;  %v63_v3 = vld [vmem:[#allocation7] sm:$0xff]  ;;  %v142_v4 = vld [vmem:[#allocation9] sm:$0xff]  ;;  %v62_v5 = vld [vmem:[#allocation4] sm:$0xff] }
  0x37   :  { %69 = vmatprep.subr.mxu0 %v64_v1  ;;  %144 = vmatprep.subr.mxu1 %v143_v2  ;;  %v268_v7 = vshrl.u32 %v267_v6, 7  ;;  %v273_v9 = vand.u32 127, %v267_v6  ;;  %v217_v11 = vld [vmem:[%s532_s3] sm:$0x3]  ;;  %s442_s3 = smov [#allocation10]  }
  0x38   :  { %70 = vmatpush1.msra.mxu0 %v63_v3  ;;  %145 = vmatpush1.msra.mxu1 %v142_v4  ;;  %v218_v12 = vld [vmem:[%s533_s4] sm:$0x3]  ;;  %s327_s4 = sshll.u32 %s442_s3, 4  ;;  %s328_s4 = int_to_ptr.vmem [resolvable:$true] %s327_s4 }
  0x39   :  { %337 = vmatmul.mubr.msk.f32.vlgmr.msra.gmra.mrb[0].mxu0 %vm65_vm0, %v62_v5  ;;  %338 = vmatmul.mubr.msk.f32.vlgmr.msra.gmra.mrb[0].mxu1 %vm65_vm0, %v62_v5  ;;  %v275_v8 = vmul.u32 32, %v268_v7  ;;  %v294_v10 = vsub.s32 0, %v268_v7  ;;  %v298_v14 = vsub.s32 1, %v268_v7  ;;  %v274_v15 = vadd.s32 128, %v273_v9  ;;  %s410_s30 = scalar_lea.vmem %s328_s4, 256  ;;  %p415_p11 = scmp.lt.s32.totalorder %s328_s4, %s328_s4 }
  0x3a   :  { %p411_p10 = scmp.ne.s32.totalorder %s328_s4, %s410_s30  ;;  %p416_p12 = scmp.lt.s32.totalorder %s410_s30, %s410_s30 }
  0x3b   :  { %v276_v13 = vadd.s32 32, %v275_v8  ;;  %v295_v16 = vrot.slane %v218_v12, %v294_v10  ;;  %v306_v17 = vrot.slane %v217_v11, %v294_v10  ;;  %v299_v18 = vrot.slane %v218_v12, %v298_v14 }
  0x3c   :  { %v310_v19 = vrot.slane %v217_v11, %v298_v14  ;;  %vm279_vm3 = vcmp.ge.s32.totalorder %v273_v9, %v275_v8  ;;  %vm280_vm5 = vcmp.ge.s32.totalorder %v274_v15, %v275_v8  ;;  %p417_p13 = por %p416_p12, %p415_p11 }
  0x3d   :  { %vm277_vm1 = vcmp.ge.s32.totalorder %v273_v9, %v276_v13  ;;  %vm278_vm2 = vcmp.ge.s32.totalorder %v274_v15, %v276_v13  ;;  %vm281_vm4 = vcmp.lt.s32.totalorder %v273_v9, %v276_v13  ;;  %vm282_vm6 = vcmp.lt.s32.totalorder %v274_v15, %v276_v13 }
  0x3e   :  { %v313_v20 = vsel %vm277_vm1, %v295_v16, %v306_v17  ;;  %v314_v23 = vsel %vm278_vm2, %v299_v18, %v310_v19  ;;  %vm283_vm7 = vmand %vm279_vm3, %vm281_vm4  ;;  %p418_p0 = pnand %p417_p13, %p411_p10 }
  0x3f   :  { %vm284_vm8 = vmand %vm280_vm5, %vm282_vm6 }
 0x10c   :  { %v135_v21 = vpop.f32.mrb[0].mxu0  ;;  %v210_v22 = vpop.f32.mrb[0].mxu1 }
 0x10d   :  { %v289_v24 = vsel %vm277_vm1, %v135_v21, %v210_v22  ;;  %v137_v25 = vpop.f32.mrb[1].mxu0  ;;  %v212_v26 = vpop.f32.mrb[1].mxu1 }
 0x10e   :  { %v315_v27 = vadd.f32 %v313_v20, %v289_v24  ;;  %v290_v28 = vsel %vm278_vm2, %v137_v25, %v212_v26 }
 0x10f   :  { %v316_v29 = vadd.f32 %v314_v23, %v290_v28 }
 0x110   :  { %v317_v30 = vsel %vm283_vm7, 0.0, %v315_v27 }
 0x111   :  { %v318_v31 = vsel %vm284_vm8, 0.0, %v316_v29  ;;  %319 = vst [vmem:[#allocation10] sm:$0xff] %v317_v30 }
 0x112   :  { %320 = vst [vmem:[#allocation10 + $0x8] sm:$0xff] %v318_v31 }
 0x113   :  { %421 = shalt.err (!%p418_p0)
}
 0x114   :  { %s422_s8 = scalar_lea.hbm %s534_s5, 256 }
 0x115   :  { %p423_p1 = scmp.ne.s32.totalorder %s534_s5, %s422_s8  ;;  %p426_p2 = scmp.lt.u32.totalorder %s422_s8, %s534_s5 }
 0x117   :  { %p428_p3 = pnand %p426_p2, %p423_p1 }
 0x119   :  { %431 = shalt.err (!%p428_p3)
}
 0x11a   :  { %330 = dma.vmem_to_hbm [thread:$0]  %s328_s4, 256, %s534_s5, [#allocation6]  }
 0x11b   :  { %436 = dma.done.wait [#allocation6], 256  }
 0x11c   :  { %437 = vsyncadd [#allocation6], 4294967040 }
 0x11d   :  { %334 = vsyncpa [#allocation5], 1 }
 0x11e   :  { %335 = vsyncpa [#allocation8], 1 }
 0x11f   :  { %336 = vsyncpa [#allocation6], 1 }

</bundles_post_ra>
